<compile_context>
chip_gen: v7x
topology: tpu7x:2x2x1
jax: 0.10.0
libtpu: 0.0.40
codegen_flags: <defaults>
</compile_context>

<pallas_src>
import functools

import jax
import jax.numpy as jnp
from jax.experimental import pallas as pl
from jax.experimental.pallas import tpu as pltpu


# ----------------------------------------------------------------------------
# helpers
# ----------------------------------------------------------------------------
def _round_up(x, m):
    return ((x + m - 1) // m) * m


def l2_norm(x, axis):
    # F.normalize(p=2): x / clamp_min(||x||_2, 1e-12)
    n = jnp.sqrt(jnp.sum(x * x, axis=axis, keepdims=True))
    return x / jnp.maximum(n, 1e-12)


def build_weight_slab(memory, clutter_bank, kp):
    """bf16 slab [mem_flat | clutter_bank | 0-pad] lane-padded to width kp."""
    c, d, j = memory.shape
    mem_flat = jnp.transpose(memory, (1, 0, 2)).reshape(d, c * j)
    w = jnp.concatenate([mem_flat, clutter_bank], axis=1)
    w = jnp.pad(w, ((0, 0), (0, kp - w.shape[1])))
    return w.astype(jnp.bfloat16)


def _pick_tile_k(kp, d, rows_pad):
    """Largest multiple-of-128 column tile that (a) divides kp and (b) keeps the
    double-buffered working set under ~40 MiB (portable to v7x's 64 MiB VMEM)."""
    per_col = 2 * (d * 2) + 2 * (rows_pad * 4)   # bf16 w in, f32 sim/noise out
    budget = 40 << 20
    tk = max(128, min(4096, (budget // per_col) // 128 * 128))
    tk = min(tk, kp)
    while kp % tk:
        tk -= 128
    return tk


# ----------------------------------------------------------------------------
# Pallas fused-similarity kernel
#   x  : (Rv_p + Rn_p, D) bf16  vertex rows first, then noise rows (row-padded)
#   w  : (D, Kp)          bf16  persistent [mem | clutter | pad] slab
#   out: (Rv_p, Kp) f32 vertex similarities, (Rn_p, Kp) f32 noise similarities
# Column-tiled grid; x and the current w tile resident in VMEM, lane-dense outs.
# ----------------------------------------------------------------------------
def _sim_kernel(x_ref, w_ref, o_sim_ref, o_noise_ref, *, rv_p):
    res = jnp.dot(x_ref[...], w_ref[...], preferred_element_type=jnp.float32)
    o_sim_ref[...] = res[:rv_p]
    o_noise_ref[...] = res[rv_p:]


def fused_similarity(x, w, rv_p, rn_p, tk):
    rp, d = x.shape
    d2, kp = w.shape
    assert d == d2 and rp == rv_p + rn_p and kp % tk == 0
    n_tiles = kp // tk
    cost = pl.CostEstimate(
        flops=2 * rp * d * kp,
        transcendentals=0,
        bytes_accessed=2 * rp * d + 2 * d * kp + 4 * rp * kp,
    )
    vmem_need = (rp * d * 2                                   # resident x (bf16)
                 + 2 * (d * tk * 2)                           # dbl-buffered w tile
                 + 2 * (rv_p * tk * 4 + rn_p * tk * 4))       # dbl-buffered outs
    vmem_limit = int(min(48 << 20, max(16 << 20, 2 * vmem_need)))
    return pl.pallas_call(
        functools.partial(_sim_kernel, rv_p=rv_p),
        out_shape=(jax.ShapeDtypeStruct((rv_p, kp), jnp.float32),
                   jax.ShapeDtypeStruct((rn_p, kp), jnp.float32)),
        grid_spec=pltpu.PrefetchScalarGridSpec(
            num_scalar_prefetch=0,
            grid=(n_tiles,),
            in_specs=[
                pl.BlockSpec((rp, d), lambda j: (0, 0)),     # x: stays resident
                pl.BlockSpec((d, tk), lambda j: (0, j)),     # w: column tiles
            ],
            out_specs=[
                pl.BlockSpec((rv_p, tk), lambda j: (0, j)),
                pl.BlockSpec((rn_p, tk), lambda j: (0, j)),
            ],
        ),
        compiler_params=pltpu.CompilerParams(
            dimension_semantics=("parallel",),   # tiles shard across v7x's 2 TCs
            vmem_limit_bytes=vmem_limit,
        ),
        cost_estimate=cost,
    )(x, w)


# ----------------------------------------------------------------------------
# Fully-jitted functional step (similarities + in-place buffer maintenance)
# ----------------------------------------------------------------------------
def make_step(momentum, num_clutter, bank_size, max_n):
    @functools.partial(jax.jit,
                       static_argnames=("update_vertices", "update_clutter"),
                       donate_argnums=(0, 1, 2))   # memory, clutter_bank, w_pad
    def step(memory, clutter_bank, w_pad, lru, features, visible, img_label,
             update_vertices=True, update_clutter=True):
        c, d, j = memory.shape                      # n_classes, mesh_dim, max_n
        b, n, _ = features.shape
        k_mem = c * j
        k_tot = k_mem + clutter_bank.shape[1]
        kp = w_pad.shape[1]
        nn = n - max_n

        # trace-time checks of the module's implicit contracts
        assert nn == num_clutter, "features must carry exactly num_clutter noise rows"
        assert bank_size % b == 0, "bank_size must be a multiple of the batch size"

        rv, rn = b * max_n, b * nn
        rv_p, rn_p = _round_up(rv, 8), _round_up(rn, 8)
        tk = _pick_tile_k(kp, d, rv_p + rn_p)

        # --- fused similarity matmul (Pallas), bf16 operands / f32 accum -----
        xv = jnp.pad(features[:, :max_n, :].reshape(rv, d), ((0, rv_p - rv), (0, 0)))
        xn = jnp.pad(features[:, max_n:, :].reshape(rn, d), ((0, rn_p - rn), (0, 0)))
        x = jnp.concatenate([xv, xn], axis=0).astype(jnp.bfloat16)
        o_sim, o_noise = fused_similarity(x, w_pad, rv_p, rn_p, tk)
        similarity = o_sim[:rv, :k_tot].reshape(b, max_n, k_tot)
        noise_similarity = o_noise[:rn, :k_mem].reshape(b, nn, k_mem)

        zero = jnp.int32(0)

        # --- updateMemory (no_grad side effect in PyTorch) --------------------
        if update_vertices:
            count_label = jnp.bincount(img_label, length=c)
            onehot = jax.nn.one_hot(img_label, c, dtype=features.dtype)
            denom = jnp.where(count_label > 0, count_label, 1).astype(features.dtype)
            lwo = onehot / denom[None, :]                       # (B, C)
            vis = visible.astype(features.dtype)[..., None]
            flat = (features[:, :max_n, :] * vis).reshape(b, -1)  # (B, max_n*D)
            vkp = (lwo.T @ flat).reshape(c, max_n, d)
            vkp = jnp.transpose(vkp, (0, 2, 1))                  # (C, D, max_n)
            vkp = jnp.where((count_label == 0)[:, None, None], memory, vkp)
            memory = l2_norm(memory * momentum + vkp * (1.0 - momentum), axis=1)
            mem_flat = jnp.transpose(memory, (1, 0, 2)).reshape(d, k_mem)
            w_pad = jax.lax.dynamic_update_slice(
                w_pad, mem_flat.astype(w_pad.dtype), (zero, zero))

        # --- updateClutter -----------------------------------------------------
        if update_clutter:
            # PyTorch increments lru first, then writes slot `lru`; keep ordering.
            lru = (lru + 1) % (bank_size // b)
            lo = (lru * (num_clutter * b)).astype(jnp.int32)
            # only the new columns need normalizing (old columns are unit-norm)
            new_cols = l2_norm(features[:, max_n:, :].reshape(rn, d).T, axis=0)
            clutter_bank = jax.lax.dynamic_update_slice(clutter_bank, new_cols,
                                                        (zero, lo))
            w_pad = jax.lax.dynamic_update_slice(
                w_pad, new_cols.astype(w_pad.dtype), (zero, jnp.int32(k_mem) + lo))

        return similarity, noise_similarity, memory, clutter_bank, w_pad, lru

    return step


# ----------------------------------------------------------------------------
# MeshMemory (thin stateful wrapper around the jitted functional step)
# ----------------------------------------------------------------------------
class MeshMemoryJax:
    def __init__(self, cfg: dict, n_classes: int, key):
        self.cfg = dict(cfg)
        k1, k2 = jax.random.split(key)
        mesh_dim = int(cfg["mesh_dim"])
        max_n = int(cfg["max_n"])
        num_clutter = int(cfg["num_clutter"])
        bank_size = int(cfg["bank_size"])

        memory = jax.random.normal(k1, (n_classes, mesh_dim, max_n), jnp.float32)
        self.memory = l2_norm(memory, axis=1)
        cb = jax.random.normal(k2, (mesh_dim, num_clutter * bank_size), jnp.float32)
        self.clutter_bank = l2_norm(cb, axis=0)
        self.lru = jnp.array(0, jnp.int32)

        # persistent, lane-padded bf16 weight slab [mem | clutter | pad];
        # maintained in place by the jitted step (no per-step rebuild).
        k_tot = n_classes * max_n + num_clutter * bank_size
        self.kp = _round_up(max(k_tot, 128), 128)
        self.w_pad = build_weight_slab(self.memory, self.clutter_bank, self.kp)

        self._step = make_step(momentum=float(cfg["momentum"]),
                               num_clutter=num_clutter,
                               bank_size=bank_size,
                               max_n=max_n)

    @property
    def n_classes(self):
        return self.memory.shape[0]

    def forward(self, features, visible, img_label,
                updateVertices=True, updateClutter=True):
        (sim, noise_sim, self.memory, self.clutter_bank,
         self.w_pad, self.lru) = self._step(
            self.memory, self.clutter_bank, self.w_pad, self.lru,
            features, visible, img_label,
            update_vertices=bool(updateVertices),
            update_clutter=bool(updateClutter))
        return sim, noise_sim


# ----------------------------------------------------------------------------
if __name__ == "__main__":
    key = jax.random.PRNGKey(0)
    k_mem, k_feat, k_vis, k_lab = jax.random.split(key, 4)

    cfg = dict(distance_thr=0.1, num_clutter=2, bank_size=8, momentum=0.9,
               mesh_dim=32, max_n=8, weight_noise=0.0, n_list=[8])
    n_classes = 4
    B = 2
    N = cfg["max_n"] + cfg["num_clutter"]       # 8 mesh vertices + 2 clutter feats

    mesh = MeshMemoryJax(cfg, n_classes, k_mem)

    features = jax.random.normal(k_feat, (B, N, cfg["mesh_dim"]), jnp.float32)
    visible = jax.random.uniform(k_vis, (B, cfg["max_n"])) > 0.3
    img_label = jax.random.randint(k_lab, (B,), 0, n_classes)

    K_mem = n_classes * cfg["max_n"]
    K_tot = K_mem + cfg["num_clutter"] * cfg["bank_size"]

    # Pure-JAX reference with the same bf16 operand quantization, built from the
    # PRE-update buffers.  Computed BEFORE forward() because the jitted step
    # donates (and thus invalidates) the state buffers.
    mem_bf = mesh.memory.astype(jnp.bfloat16).astype(jnp.float32)
    cb_bf = mesh.clutter_bank.astype(jnp.bfloat16).astype(jnp.float32)
    feat_bf = features.astype(jnp.bfloat16).astype(jnp.float32)
    vert_bf, noise_bf = feat_bf[:, :cfg["max_n"]], feat_bf[:, cfg["max_n"]:]
    feat_sim_ref = jnp.einsum('biv,cvj->bicj', vert_bf, mem_bf).reshape(
        B, cfg["max_n"], -1)
    clut_sim_ref = jnp.einsum('biv,vn->bin', vert_bf, cb_bf)
    sim_ref = jnp.concatenate([feat_sim_ref, clut_sim_ref], axis=-1)
    mem_flat_bf = jnp.transpose(mem_bf, (1, 0, 2)).reshape(cfg["mesh_dim"], K_mem)
    noise_ref = noise_bf @ mem_flat_bf
    sim_ref, noise_ref = jax.block_until_ready((sim_ref, noise_ref))

    sim, noise_sim = mesh.forward(features, visible, img_label)
    jax.block_until_ready((sim, noise_sim, mesh.memory, mesh.clutter_bank, mesh.w_pad))

    # Shape checks (match the PyTorch forward exactly).
    assert sim.shape == (B, cfg["max_n"], K_tot)
    assert noise_sim.shape == (B, N - cfg["max_n"], K_mem)

    # Numerical check of the fused Pallas matmul (bf16 operands, f32 accum).
    assert jnp.allclose(sim, sim_ref, atol=2e-3, rtol=2e-3)
    assert jnp.allclose(noise_sim, noise_ref, atol=2e-3, rtol=2e-3)

    # Second forward exercises the state carry (updated memory, in-place slab,
    # clutter ring-buffer slot, lru) through the same compiled step.
    sim2, noise_sim2 = mesh.forward(features, visible, img_label)
    jax.block_until_ready((sim2, noise_sim2, mesh.memory, mesh.clutter_bank,
                           mesh.w_pad))
    assert sim2.shape == sim.shape and noise_sim2.shape == noise_sim.shape

    print("KERNEL_OK")
</pallas_src>

<mosaic_0001>
module attributes {stable_mosaic.version = 11 : i64} {
  func.func @_sim_kernel(%arg0: i32, %arg1: memref<24x32xbf16, #tpu.memory_space<vmem>>, %arg2: memref<32x128xbf16, #tpu.memory_space<vmem>>, %arg3: memref<16x128xf32, #tpu.memory_space<vmem>>, %arg4: memref<8x128xf32, #tpu.memory_space<vmem>>) attributes {dimension_semantics = [#tpu.dimension_semantics<parallel>], iteration_bounds = array<i64: 1>, scalar_prefetch = 0 : i64, scratch_operands = 0 : i64, tpu.core_type = #tpu.core_type<tc>, window_params = [{pipeline_mode = #tpu.pipeline_mode<synchronous>, transform_indices = @transform_0, window_bounds = array<i64: 24, 32>}, {transform_indices = @transform_1, window_bounds = array<i64: 32, 128>}, {transform_indices = @transform_2, window_bounds = array<i64: 16, 128>}, {transform_indices = @transform_3, window_bounds = array<i64: 8, 128>}]} {
    %c0 = arith.constant 0 : index
    %c0_0 = arith.constant 0 : index
    %0 = vector.load %arg1[%c0, %c0_0] : memref<24x32xbf16, #tpu.memory_space<vmem>>, vector<24x32xbf16>
    %c0_1 = arith.constant 0 : index
    %c0_2 = arith.constant 0 : index
    %1 = vector.load %arg2[%c0_1, %c0_2] : memref<32x128xbf16, #tpu.memory_space<vmem>>, vector<32x128xbf16>
    %cst = arith.constant dense<0.000000e+00> : vector<24x128xf32>
    %2 = tpu.matmul %0, %1, %cst {dimension_numbers = #tpu.dot_dimension_numbers<[1], [0], [0], [1], [0, 0, 1, 1], [], []>} : vector<24x32xbf16>, vector<32x128xbf16>, vector<24x128xf32> -> vector<24x128xf32>
    %3 = vector.extract_strided_slice %2 {offsets = [0, 0], sizes = [16, 128], strides = [1, 1]} : vector<24x128xf32> to vector<16x128xf32>
    %c0_3 = arith.constant 0 : index
    %c0_4 = arith.constant 0 : index
    %4 = vector.load %arg3[%c0_3, %c0_4] : memref<16x128xf32, #tpu.memory_space<vmem>>, vector<16x128xf32>
    tpu.vector_store %arg3[%c0_3, %c0_4], %3 {strides = array<i32>} : memref<16x128xf32, #tpu.memory_space<vmem>>, vector<16x128xf32>,
    %5 = vector.extract_strided_slice %2 {offsets = [16, 0], sizes = [8, 128], strides = [1, 1]} : vector<24x128xf32> to vector<8x128xf32>
    %c0_5 = arith.constant 0 : index
    %c0_6 = arith.constant 0 : index
    %6 = vector.load %arg4[%c0_5, %c0_6] : memref<8x128xf32, #tpu.memory_space<vmem>>, vector<8x128xf32>
    tpu.vector_store %arg4[%c0_5, %c0_6], %5 {strides = array<i32>} : memref<8x128xf32, #tpu.memory_space<vmem>>, vector<8x128xf32>,
    return
  }
  func.func @transform_0(%arg0: i32) -> (i32, i32) {
    %c0_i32 = arith.constant 0 : i32
    %c0_i32_0 = arith.constant 0 : i32
    %c0_i32_1 = arith.constant 0 : i32
    return %c0_i32, %c0_i32_0 : i32, i32
  }
  func.func @transform_1(%arg0: i32) -> (i32, i32) {
    %c0_i32 = arith.constant 0 : i32
    %c0_i32_0 = arith.constant 0 : i32
    return %c0_i32, %arg0 : i32, i32
  }
  func.func @transform_2(%arg0: i32) -> (i32, i32) {
    %c0_i32 = arith.constant 0 : i32
    %c0_i32_0 = arith.constant 0 : i32
    return %c0_i32, %arg0 : i32, i32
  }
  func.func @transform_3(%arg0: i32) -> (i32, i32) {
    %c0_i32 = arith.constant 0 : i32
    %c0_i32_0 = arith.constant 0 : i32
    return %c0_i32, %arg0 : i32, i32
  }
}

</mosaic_0001>

<bundles_post_ra>
// kernel: step.1
= control target key start
LH: loop header
LB: loop body
LE: loop exit
PB: predicated region body
PF: predicated region fallthrough
CT: control target
= control target key end

     0   :  { %vm41_vm0 = vcmask 261120   ;;  %s170_s1 = inlined_call_operand.vmem [shape: bf16[32,128], index: 1, kind: input, shape index: {}]   ;;  %s171_s0 = inlined_call_operand.vmem [shape: bf16[24,32], index: 0, kind: input, shape index: {}]   ;;  %s172_s3 = inlined_call_operand.vmem [shape: f32[8,128], index: 3, kind: output, shape index: {1}]   ;;  %s173_s2 = inlined_call_operand.vmem [shape: f32[16,128], index: 2, kind: output, shape index: {0}]  }
   0x1   :  { %v125_v0 = vld [vmem:[%s170_s1] sm:$0xff]   ;;  %v126_v1 = vld [vmem:[%s170_s1 + $0x8] sm:$0xff]  }
   0x2   :  { %117 = vmatprep.subr.bf16.mxu0 %v125_v0  ;;  %v127_v2 = vld [vmem:[%s171_s0] sm:$0xff]   ;;  %v128_v3 = vld [vmem:[%s171_s0 + $0x8] ss:$0 sps:$4 sm:$0xff]  }
   0x3   :  { %118 = vmatpush3.bf16.msra.mxu0 %v125_v0  ;;  %121 = vmatprep.mubr.msk.bf16.mxu0 %vm41_vm0, %v127_v2 }
   0x4   :  { %119 = vmatprep.subr.bf16.mxu0 %v126_v1 }
   0x7   :  { %120 = vmatpush3.bf16.msra.mxu0 %v126_v1 }
   0xa   :  { %122 = vmatmul.mubr.msk.bf16.vlgmr.msra.gmra.mrb[0].mxu0 %vm41_vm0, %v128_v3 }
  0xdd   :  { %v123_v4 = vpop.f32.mrb[0].mxu0 }
  0xde   :  { %98 = vst [vmem:[%s172_s3] sm:$0xff] %v123_v4  ;;  %v82_v5 = vpop.f32.mrb[1].mxu0 }
  0xdf   :  { %96 = vst [vmem:[%s173_s2] sm:$0xff] %v82_v5  ;;  %v124_v6 = vpop.f32.mrb[2].mxu0 }
  0xe0   :  { %v85_v7 = vpop.f32.mrb[3].mxu0 }
  0xe1   :  { %97 = vst [vmem:[%s173_s2 + $0x8] sm:$0xff] %v85_v7 }

</bundles_post_ra>
